<compile_context>
chip_gen: v7x
topology: tpu7x:2x2x1
jax: 0.10.0
libtpu: 0.0.40
codegen_flags: <defaults>
</compile_context>

<pallas_src>
import jax
import jax.numpy as jnp
import numpy as np
from jax.experimental import pallas as pl
from jax.experimental.pallas import tpu as pltpu


def _round_up(x, m):
    return (x + m - 1) // m * m


def _make_kernel(approx_recip):
    def kernel(len_ref,                 # (Bq, 1)   int32  memory lengths
               mem_ref,                 # (Bq, Sm, Dp)     memory (compute dtype)
               bias_ref,                # (Bq, 1, Dp) f32  Wh@h + Wc@c (hoisted)
               wmt_ref,                 # (Dp, Dp)         Wm^T ([in, out], resident)
               v_ref,                   # (1, 1, Dp) f32   v (resident)
               ctx_ref,                 # (Bq, 1, Dp) f32  context out
               attn_ref):               # (Bq, 1, Sm) f32  attention out
        bq, sm, dp = mem_ref.shape
        f32 = jnp.float32

        mem = mem_ref[...]                                        # (Bq, Sm, Dp)

        # --- Wm projection: one big MXU matmul, M = Bq*Sm (free reshape). ---
        mem2 = mem.reshape(bq * sm, dp)
        wm = jnp.dot(mem2, wmt_ref[...], preferred_element_type=f32)
        wm = wm.reshape(bq, sm, dp)                               # (Bq, Sm, Dp) f32

        # e = tanh(Wm m + (Wh h + Wc c));  single sublane-broadcast add.
        e = jnp.tanh(wm + bias_ref[...])                          # f32

        # logits[b, 0, s] = v . e[b, s, :]  -- batched MXU dot (flash-attn style,
        # no transpose of the big e tile).
        v_b = jnp.broadcast_to(v_ref[...], (bq, 1, dp))           # (Bq, 1, Dp)
        logits = jnp.einsum('bqd,bsd->bqs', v_b, e,
                            preferred_element_type=f32)           # (Bq, 1, Sm)

        # Mask positions >= memory_length with -inf (== masked_fill_); padded
        # source rows (>= S >= length) are masked too.
        pos = jax.lax.broadcasted_iota(jnp.int32, (bq, 1, sm), 2)
        lens = len_ref[...][:, :, None]                           # (Bq, 1, 1) i32
        logits = jnp.where(pos < lens, logits, -jnp.inf)

        # Softmax over the source positions (lane axis), f32 throughout.
        m = jnp.max(logits, axis=2, keepdims=True)
        p = jnp.exp(logits - m)
        denom = jnp.sum(p, axis=2, keepdims=True)
        if approx_recip:
            attn = p * pl.reciprocal(denom, approx=True)          # EUP slot
        else:
            attn = p / denom                                      # exact (f32 path)

        # context = attn @ memory  (batched MXU matmul; masked positions are 0).
        ctx = jnp.einsum('bqs,bsd->bqd', attn.astype(mem.dtype), mem,
                         preferred_element_type=f32)              # (Bq, 1, Dp)

        ctx_ref[...] = ctx
        attn_ref[...] = attn

    return kernel


def bahdanau_copy_attention(query, memory, coverage, memory_length,
                            w_h, w_m, w_c, v_w, *, compute_dtype=jnp.bfloat16):
    """query/coverage: [B, D]; memory: [B, S, D]; memory_length: [B] or None.
    Weights follow nn.Linear layout ([out, in]); v_w is [1, D].
    Returns (context [B, D] f32, attn [B, S] f32)."""
    B, S, D = memory.shape
    f32 = jnp.float32
    cdt = jnp.dtype(compute_dtype)
    cbytes = cdt.itemsize

    Dp = _round_up(D, 128)               # lane-dense hidden dim (no-op if aligned)
    sub = 32 // cbytes                    # sublane multiple: 8 (f32) / 16 (bf16)
    Sm = _round_up(S, sub)                # sublane-only padding of S

    # Batch block: multiple of 8, capped at 64 and at what B needs, and shrunk
    # until the double-buffered memory tile fits a conservative VMEM budget
    # (keeps the kernel inside v7x's 32 MiB default scoped VMEM with the
    # resident Wm / v and the small bias / output tiles).
    budget = 8 * 1024 * 1024
    Bq = min(64, _round_up(B, 8))
    while Bq > 8 and 2 * Bq * Sm * Dp * cbytes > budget:
        Bq -= 8
    Bq = max(8, Bq)
    Bp = _round_up(B, Bq)

    # ---- wrapper-side (XLA) prep: hoisted projections + alignment padding ----
    # bias = Wh h + Wc c for the whole batch: two (B,D)x(D,D) matmuls, done once
    # by XLA instead of 2*B M=1 matvecs inside the kernel.
    bias = (query.astype(f32) @ w_h.astype(f32).T
            + coverage.astype(f32) @ w_c.astype(f32).T)           # (B, D) f32

    if memory_length is None:
        lengths = jnp.full((B,), S, jnp.int32)
    else:
        lengths = memory_length.astype(jnp.int32).reshape(B)

    def pad(x, shape):
        if tuple(x.shape) == tuple(shape):
            return x                                              # no copy when aligned
        return jnp.pad(x, [(0, t - s) for s, t in zip(x.shape, shape)])

    # Zero padding is exactly neutral: padded Wm rows/cols, v entries, bias and
    # memory entries are zero, and padded source positions are masked.
    memp = pad(memory.astype(cdt), (Bp, Sm, Dp))
    biasp = pad(bias.reshape(B, 1, D), (Bp, 1, Dp))
    wmt = pad(w_m.astype(cdt).T, (Dp, Dp))            # pre-transposed: [in, out]
    vp = pad(v_w.astype(f32).reshape(1, 1, D), (1, 1, Dp))
    # Padded batch rows get length = S (avoids all -inf rows; they are sliced off).
    lensp = jnp.full((Bp, 1), S, jnp.int32).at[:B, 0].set(lengths)

    grid = (Bp // Bq,)
    grid_spec = pltpu.PrefetchScalarGridSpec(
        num_scalar_prefetch=0,
        grid=grid,
        in_specs=[
            pl.BlockSpec((Bq, 1), lambda b: (b, 0)),              # lengths
            pl.BlockSpec((Bq, Sm, Dp), lambda b: (b, 0, 0)),      # memory
            pl.BlockSpec((Bq, 1, Dp), lambda b: (b, 0, 0)),       # bias (Wh h + Wc c)
            pl.BlockSpec((Dp, Dp), lambda b: (0, 0)),             # Wm^T (resident)
            pl.BlockSpec((1, 1, Dp), lambda b: (0, 0, 0)),        # v    (resident)
        ],
        out_specs=(
            pl.BlockSpec((Bq, 1, Dp), lambda b: (b, 0, 0)),       # context
            pl.BlockSpec((Bq, 1, Sm), lambda b: (b, 0, 0)),       # attn
        ),
    )

    cost = pl.CostEstimate(
        flops=int(2 * Bp * Sm * Dp * Dp + 4 * Bp * Sm * Dp),
        transcendentals=int(Bp * Sm * Dp + Bp * Sm),
        bytes_accessed=int(memp.size * cbytes + wmt.size * cbytes
                           + biasp.size * 4 + vp.size * 4 + lensp.size * 4
                           + Bp * Dp * 4 + Bp * Sm * 4),
    )

    ctx_p, attn_p = pl.pallas_call(
        _make_kernel(approx_recip=(cdt != jnp.dtype(jnp.float32))),
        out_shape=(jax.ShapeDtypeStruct((Bp, 1, Dp), f32),
                   jax.ShapeDtypeStruct((Bp, 1, Sm), f32)),
        grid_spec=grid_spec,
        compiler_params=pltpu.CompilerParams(
            dimension_semantics=("parallel",)),
        cost_estimate=cost,
    )(lensp, memp, biasp, wmt, vp)

    return ctx_p[:B, 0, :D], attn_p[:B, 0, :S]


def _reference(query, memory, coverage, memory_length, w_h, w_m, w_c, v_w):
    B, S, D = memory.shape
    wh = query @ w_h.T
    wm = memory @ w_m.T
    wc = coverage @ w_c.T
    e = jnp.tanh(wh[:, None, :] + wm + wc[:, None, :])
    logits = jnp.einsum('bsd,od->bs', e, v_w)
    pos = jnp.arange(S)[None, :]
    valid = pos < memory_length[:, None]
    logits = jnp.where(valid, logits, -jnp.inf)
    attn = jax.nn.softmax(logits, axis=1)
    ctx = jnp.einsum('bs,bsd->bd', attn, memory)
    return ctx, attn


if __name__ == "__main__":
    B, S, D = 3, 10, 32
    key = jax.random.PRNGKey(0)
    k_q, k_m, k_c, k_wh, k_wm, k_wc, k_v = jax.random.split(key, 7)

    # Deterministic parameter init (shapes follow nn.Linear: weight is [out, in]).
    bound = 1.0 / np.sqrt(D)
    w_h = jax.random.uniform(k_wh, (D, D), jnp.float32, -bound, bound)
    w_m = jax.random.uniform(k_wm, (D, D), jnp.float32, -bound, bound)
    w_c = jax.random.uniform(k_wc, (D, D), jnp.float32, -bound, bound)
    v_w = jax.random.uniform(k_v, (1, D), jnp.float32, -bound, bound)

    query = jax.random.normal(k_q, (B, D), jnp.float32)
    memory = jax.random.normal(k_m, (B, S, D), jnp.float32)
    coverage = jax.random.normal(k_c, (B, D), jnp.float32)
    memory_length = jnp.array([S, 6, 3], dtype=jnp.int32)

    ctx_ref, attn_ref = _reference(query, memory, coverage, memory_length,
                                   w_h, w_m, w_c, v_w)

    # Strict f32 path (exact semantics check).
    ctx32, attn32 = bahdanau_copy_attention(query, memory, coverage, memory_length,
                                            w_h, w_m, w_c, v_w,
                                            compute_dtype=jnp.float32)
    jax.block_until_ready((ctx32, attn32))
    np.testing.assert_allclose(np.asarray(ctx32), np.asarray(ctx_ref),
                               rtol=1e-5, atol=1e-5)
    np.testing.assert_allclose(np.asarray(attn32), np.asarray(attn_ref),
                               rtol=1e-5, atol=1e-5)

    # Default (bf16 operands, f32 accumulation) production path.
    ctx_bf, attn_bf = bahdanau_copy_attention(query, memory, coverage, memory_length,
                                              w_h, w_m, w_c, v_w)
    jax.block_until_ready((ctx_bf, attn_bf))
    np.testing.assert_allclose(np.asarray(ctx_bf), np.asarray(ctx_ref),
                               rtol=5e-2, atol=5e-2)
    np.testing.assert_allclose(np.asarray(attn_bf), np.asarray(attn_ref),
                               rtol=5e-2, atol=5e-2)

    print("KERNEL_OK")
</pallas_src>

<mosaic_0001>
module attributes {stable_mosaic.version = 11 : i64} {
  func.func @kernel(%arg0: i32, %arg1: memref<8x1xi32, #tpu.memory_space<vmem>>, %arg2: memref<8x16x128xf32, #tpu.memory_space<vmem>>, %arg3: memref<8x1x128xf32, #tpu.memory_space<vmem>>, %arg4: memref<128x128xf32, #tpu.memory_space<vmem>>, %arg5: memref<1x1x128xf32, #tpu.memory_space<vmem>>, %arg6: memref<8x1x128xf32, #tpu.memory_space<vmem>>, %arg7: memref<8x1x16xf32, #tpu.memory_space<vmem>>) attributes {dimension_semantics = [#tpu.dimension_semantics<parallel>], iteration_bounds = array<i64: 1>, scalar_prefetch = 0 : i64, scratch_operands = 0 : i64, tpu.core_type = #tpu.core_type<tc>, window_params = [{transform_indices = @transform_0, window_bounds = array<i64: 8, 1>}, {transform_indices = @transform_1, window_bounds = array<i64: 8, 16, 128>}, {transform_indices = @transform_2, window_bounds = array<i64: 8, 1, 128>}, {pipeline_mode = #tpu.pipeline_mode<synchronous>, transform_indices = @transform_3, window_bounds = array<i64: 128, 128>}, {pipeline_mode = #tpu.pipeline_mode<synchronous>, transform_indices = @transform_4, window_bounds = array<i64: 1, 1, 128>}, {transform_indices = @transform_5, window_bounds = array<i64: 8, 1, 128>}, {transform_indices = @transform_6, window_bounds = array<i64: 8, 1, 16>}]} {
    %c0 = arith.constant 0 : index
    %c0_0 = arith.constant 0 : index
    %c0_1 = arith.constant 0 : index
    %0 = vector.load %arg2[%c0, %c0_0, %c0_1] : memref<8x16x128xf32, #tpu.memory_space<vmem>>, vector<8x16x128xf32>
    %1 = vector.shape_cast %0 : vector<8x16x128xf32> to vector<128x128xf32>
    %c0_2 = arith.constant 0 : index
    %c0_3 = arith.constant 0 : index
    %2 = vector.load %arg4[%c0_2, %c0_3] : memref<128x128xf32, #tpu.memory_space<vmem>>, vector<128x128xf32>
    %cst = arith.constant dense<0.000000e+00> : vector<128x128xf32>
    %3 = tpu.matmul %1, %2, %cst {dimension_numbers = #tpu.dot_dimension_numbers<[1], [0], [0], [1], [0, 0, 1, 1], [], []>} : vector<128x128xf32>, vector<128x128xf32>, vector<128x128xf32> -> vector<128x128xf32>
    %4 = vector.shape_cast %3 : vector<128x128xf32> to vector<8x16x128xf32>
    %c0_4 = arith.constant 0 : index
    %c0_5 = arith.constant 0 : index
    %c0_6 = arith.constant 0 : index
    %5 = vector.load %arg3[%c0_4, %c0_5, %c0_6] : memref<8x1x128xf32, #tpu.memory_space<vmem>>, vector<8x1x128xf32>
    %6 = vector.broadcast %5 : vector<8x1x128xf32> to vector<8x16x128xf32>
    %7 = arith.addf %4, %6 : vector<8x16x128xf32>
    %8 = math.tanh %7 : vector<8x16x128xf32>
    %c0_7 = arith.constant 0 : index
    %c0_8 = arith.constant 0 : index
    %c0_9 = arith.constant 0 : index
    %9 = vector.load %arg5[%c0_7, %c0_8, %c0_9] : memref<1x1x128xf32, #tpu.memory_space<vmem>>, vector<1x1x128xf32>
    %10 = vector.shape_cast %9 : vector<1x1x128xf32> to vector<1x1x128xf32>
    %11 = vector.broadcast %10 : vector<1x1x128xf32> to vector<8x1x128xf32>
    "tpu.trace_start"() <{level = 10 : i32, message = "bqd,bsd->bqs"}> : () -> ()
    %cst_10 = arith.constant dense<0.000000e+00> : vector<8x1x16xf32>
    %12 = tpu.matmul %11, %8, %cst_10 {dimension_numbers = #tpu.dot_dimension_numbers<[2], [2], [1], [1], [0, 0, 0, 1, 1, 1], [0], [0]>} : vector<8x1x128xf32>, vector<8x16x128xf32>, vector<8x1x16xf32> -> vector<8x1x16xf32>
    "tpu.trace_stop"() : () -> ()
    %13 = tpu.iota {dimensions = array<i32: 2>} : vector<8x1x16xi32>
    %c0_11 = arith.constant 0 : index
    %c0_12 = arith.constant 0 : index
    %14 = vector.load %arg1[%c0_11, %c0_12] : memref<8x1xi32, #tpu.memory_space<vmem>>, vector<8x1xi32>
    %15 = vector.shape_cast %14 : vector<8x1xi32> to vector<8x1x1xi32>
    %16 = vector.broadcast %15 : vector<8x1x1xi32> to vector<8x1x16xi32>
    %17 = arith.cmpi slt, %13, %16 : vector<8x1x16xi32>
    %cst_13 = arith.constant 0xFF800000 : f32
    %18 = vector.broadcast %cst_13 : f32 to vector<8x1x16xf32>
    %19 = arith.select %17, %12, %18 : vector<8x1x16xi1>, vector<8x1x16xf32>
    %cst_14 = arith.constant dense<0xFF800000> : vector<8x1xf32>
    %20 = vector.multi_reduction <maximumf>, %19, %cst_14 [2] : vector<8x1x16xf32> to vector<8x1xf32>
    %21 = vector.shape_cast %20 : vector<8x1xf32> to vector<8x1x1xf32>
    %22 = vector.broadcast %21 : vector<8x1x1xf32> to vector<8x1x16xf32>
    %23 = arith.subf %19, %22 : vector<8x1x16xf32>
    %24 = math.exp %23 : vector<8x1x16xf32>
    %cst_15 = arith.constant dense<0.000000e+00> : vector<8x1xf32>
    %25 = vector.multi_reduction <add>, %24, %cst_15 [2] : vector<8x1x16xf32> to vector<8x1xf32>
    %26 = vector.shape_cast %25 : vector<8x1xf32> to vector<8x1x1xf32>
    %27 = vector.broadcast %26 : vector<8x1x1xf32> to vector<8x1x16xf32>
    %28 = arith.divf %24, %27 : vector<8x1x16xf32>
    "tpu.trace_start"() <{level = 10 : i32, message = "bqs,bsd->bqd"}> : () -> ()
    %cst_16 = arith.constant dense<0.000000e+00> : vector<8x1x128xf32>
    %29 = tpu.matmul %28, %0, %cst_16 {dimension_numbers = #tpu.dot_dimension_numbers<[2], [1], [1], [2], [0, 0, 0, 1, 1, 2], [0], [0]>} : vector<8x1x16xf32>, vector<8x16x128xf32>, vector<8x1x128xf32> -> vector<8x1x128xf32>
    "tpu.trace_stop"() : () -> ()
    %c0_17 = arith.constant 0 : index
    %c0_18 = arith.constant 0 : index
    %c0_19 = arith.constant 0 : index
    %30 = vector.load %arg6[%c0_17, %c0_18, %c0_19] : memref<8x1x128xf32, #tpu.memory_space<vmem>>, vector<8x1x128xf32>
    tpu.vector_store %arg6[%c0_17, %c0_18, %c0_19], %29 {strides = array<i32>} : memref<8x1x128xf32, #tpu.memory_space<vmem>>, vector<8x1x128xf32>,
    %c0_20 = arith.constant 0 : index
    %c0_21 = arith.constant 0 : index
    %c0_22 = arith.constant 0 : index
    %31 = vector.load %arg7[%c0_20, %c0_21, %c0_22] : memref<8x1x16xf32, #tpu.memory_space<vmem>>, vector<8x1x16xf32>
    tpu.vector_store %arg7[%c0_20, %c0_21, %c0_22], %28 {strides = array<i32>} : memref<8x1x16xf32, #tpu.memory_space<vmem>>, vector<8x1x16xf32>,
    return
  }
  func.func @transform_0(%arg0: i32) -> (i32, i32) {
    %c0_i32 = arith.constant 0 : i32
    %c0_i32_0 = arith.constant 0 : i32
    return %arg0, %c0_i32 : i32, i32
  }
  func.func @transform_1(%arg0: i32) -> (i32, i32, i32) {
    %c0_i32 = arith.constant 0 : i32
    %c0_i32_0 = arith.constant 0 : i32
    %c0_i32_1 = arith.constant 0 : i32
    return %arg0, %c0_i32, %c0_i32_0 : i32, i32, i32
  }
  func.func @transform_2(%arg0: i32) -> (i32, i32, i32) {
    %c0_i32 = arith.constant 0 : i32
    %c0_i32_0 = arith.constant 0 : i32
    %c0_i32_1 = arith.constant 0 : i32
    return %arg0, %c0_i32, %c0_i32_0 : i32, i32, i32
  }
  func.func @transform_3(%arg0: i32) -> (i32, i32) {
    %c0_i32 = arith.constant 0 : i32
    %c0_i32_0 = arith.constant 0 : i32
    %c0_i32_1 = arith.constant 0 : i32
    return %c0_i32, %c0_i32_0 : i32, i32
  }
  func.func @transform_4(%arg0: i32) -> (i32, i32, i32) {
    %c0_i32 = arith.constant 0 : i32
    %c0_i32_0 = arith.constant 0 : i32
    %c0_i32_1 = arith.constant 0 : i32
    %c0_i32_2 = arith.constant 0 : i32
    return %c0_i32, %c0_i32_0, %c0_i32_1 : i32, i32, i32
  }
  func.func @transform_5(%arg0: i32) -> (i32, i32, i32) {
    %c0_i32 = arith.constant 0 : i32
    %c0_i32_0 = arith.constant 0 : i32
    %c0_i32_1 = arith.constant 0 : i32
    return %arg0, %c0_i32, %c0_i32_0 : i32, i32, i32
  }
  func.func @transform_6(%arg0: i32) -> (i32, i32, i32) {
    %c0_i32 = arith.constant 0 : i32
    %c0_i32_0 = arith.constant 0 : i32
    %c0_i32_1 = arith.constant 0 : i32
    return %arg0, %c0_i32, %c0_i32_0 : i32, i32, i32
  }
}

</mosaic_0001>

<bundles_post_ra>
// kernel: tpu_custom_call.1
= control target key start
LH: loop header
LB: loop body
LE: loop exit
PB: predicated region body
PF: predicated region fallthrough
CT: control target
= control target key end

     0   :  { %12 = vsyncpa [#allocation3], 0  ;;  %s2618_s0 = inlined_call_operand.vmem [shape: s32[8,1], index: 0, kind: input, shape index: {}]   ;;  %s2619_s1 = inlined_call_operand.hbm [shape: f32[8,16,128], index: 1, kind: input, shape index: {}]   ;;  %s2620_s2 = inlined_call_operand.vmem [shape: f32[8,1,128], index: 2, kind: input, shape index: {}]   ;;  %s2621_s3 = inlined_call_operand.hbm [shape: f32[128,128], index: 3, kind: input, shape index: {}]   ;;  %s2622_s4 = inlined_call_operand.vmem [shape: f32[1,1,128], index: 4, kind: input, shape index: {}]   ;;  %s2623_s5 = inlined_call_operand.hbm [shape: f32[8,1,128], index: 5, kind: output, shape index: {0}]   ;;  %s2624_s6 = inlined_call_operand.hbm [shape: f32[8,1,16], index: 6, kind: output, shape index: {1}]  }
   0x1   :  { %13 = vsyncpa [#allocation6], 0 }
   0x2   :  { %14 = vsyncpa [#allocation4], 0 }
   0x3   :  { %15 = vsyncpa [#allocation9], 0  ;;  %s2246_s21 = smov [#allocation2]   ;;  %s2150_s25 = scalar_lea.hbm %s2619_s1, 2048 }
   0x4   :  { %s23_s22 = sshll.u32 %s2246_s21, 4  ;;  %p2151_p0 = scmp.ne.s32.totalorder %s2619_s1, %s2150_s25  ;;  %s24_s22 = int_to_ptr.vmem [resolvable:$true] %s23_s22 }
   0x5   :  { %p2154_p1 = scmp.lt.u32.totalorder %s2150_s25, %s2619_s1 }
   0x7   :  { %p2156_p2 = pnand %p2154_p1, %p2151_p0 }
   0x9   :  { %2159 = shalt.err (!%p2156_p2)
}
   0xa   :  { %s2160_s30 = scalar_lea.vmem %s24_s22, 2048  ;;  %p2165_p4 = scmp.lt.s32.totalorder %s24_s22, %s24_s22 }
   0xb   :  { %p2161_p3 = scmp.ne.s32.totalorder %s24_s22, %s2160_s30  ;;  %p2166_p5 = scmp.lt.s32.totalorder %s2160_s30, %s2160_s30 }
   0xd   :  { %p2167_p6 = por %p2166_p5, %p2165_p4 }
   0xf   :  { %p2168_p7 = pnand %p2167_p6, %p2161_p3 }
  0x11   :  { %2171 = shalt.err (!%p2168_p7)
}
  0x12   :  { %s2247_s7 = smov 128   ;;  %s2248_s8 = smov 8  }
  0x13   :  { %29 = dma.hbm_to_vmem [thread:$0]  %s2619_s1, 2048, %s24_s22, [#allocation3], %s2247_s7, %s2247_s7, %s2248_s8  }
  0x14   :  { %s2249_s11 = smov [#allocation5]   ;;  %s2172_s15 = scalar_lea.hbm %s2621_s3, 2048 }
  0x15   :  { %s37_s12 = sshll.u32 %s2249_s11, 4  ;;  %p2173_p8 = scmp.ne.s32.totalorder %s2621_s3, %s2172_s15  ;;  %s38_s12 = int_to_ptr.vmem [resolvable:$true] %s37_s12 }
  0x16   :  { %p2176_p9 = scmp.lt.u32.totalorder %s2172_s15, %s2621_s3 }
  0x18   :  { %p2178_p10 = pnand %p2176_p9, %p2173_p8 }
  0x1a   :  { %2181 = shalt.err (!%p2178_p10)
}
  0x1b   :  { %s2182_s20 = scalar_lea.vmem %s38_s12, 2048  ;;  %p2187_p12 = scmp.lt.s32.totalorder %s38_s12, %s38_s12 }
  0x1c   :  { %p2183_p11 = scmp.ne.s32.totalorder %s38_s12, %s2182_s20  ;;  %p2188_p13 = scmp.lt.s32.totalorder %s2182_s20, %s2182_s20 }
  0x1e   :  { %p2189_p0 = por %p2188_p13, %p2187_p12 }
  0x20   :  { %p2190_p1 = pnand %p2189_p0, %p2183_p11 }
  0x22   :  { %2193 = shalt.err (!%p2190_p1)
}
  0x23   :  { %43 = dma.hbm_to_vmem [thread:$0]  %s2621_s3, 2048, %s38_s12, [#allocation6], %s2247_s7, %s2247_s7, %s2248_s8  }
  0x24   :  { %2238 = dma.done.wait [#allocation3], 2048  }
  0x25   :  { %2239 = vsyncadd [#allocation3], 4294965248 }
  0x26   :  { %2240 = dma.done.wait [#allocation6], 2048  }
  0x27   :  { %2241 = vsyncadd [#allocation6], 4294965248  ;;  %v68_v0 = vld [vmem:[#allocation5] sm:$0xff]  ;;  %v69_v1 = vld [vmem:[#allocation5 + $0x8] sm:$0xff]  ;;  %v2250_v48 = vmov 0.0|0.0   ;;  %vm2251_vm0 = vmmov 0   ;;  %v878_v50 = vlaneseq }
  0x28   :  { %v70_v2 = vld [vmem:[#allocation5 + $0x10] sm:$0xff]  ;;  %v1990_v3 = vpack.c.bf16 %v69_v1, %v68_v0  ;;  %v71_v4 = vld [vmem:[#allocation5 + $0x18] sm:$0xff]  ;;  %v72_v6 = vld [vmem:[#allocation5 + $0x20] sm:$0xff]  ;;  %2022 = vmatprep.subr.bf16.mxu1 %v2250_v48  ;;  %v2252_v49 = vmov 0.0   ;;  %v2253_v51 = vmov 0   ;;  %vm1002_vm9 = vcmask 122880  }
  0x29   :  { %v1994_v5 = vpack.c.bf16 %v71_v4, %v70_v2  ;;  %v73_v7 = vld [vmem:[#allocation5 + $0x28] sm:$0xff]  ;;  %v74_v8 = vld [vmem:[#allocation5 + $0x30] sm:$0xff]  ;;  %v75_v10 = vld [vmem:[#allocation5 + $0x38] sm:$0xff]  ;;  %1882 = vmatprep.mubr.msk.f32.mxu1 %vm2251_vm0, %v2252_v49  ;;  %2083 = vset.pattern.permute.xlu0 %v2253_v51  ;;  %v2254_v52 = vmov 1966171168   ;;  %v2389_v54 = vshrl.u32 %v878_v50, 7 }
  0x2a   :  { %1991 = vmatprep.subr.bf16.mxu0 %v1990_v3  ;;  %v1998_v9 = vpack.c.bf16 %v73_v7, %v72_v6  ;;  %v2318_v11 = vld [vmem:[#allocation2] sm:$0xff]  ;;  %v2320_v12 = vld [vmem:[#allocation2 + $0x8] sm:$0xff]  ;;  %v2325_v14 = vld [vmem:[#allocation2 + $0x10] sm:$0xff]  ;;  %v2002_v27 = vpack.c.bf16 %v75_v10, %v74_v8  ;;  %v883_v53 = vunpack.c.l.s4 %v2254_v52  ;;  %2084 = vset.pattern.permute.xlu1 %v2253_v51  ;;  %vm1091_vm10 = vcmask 130048  }
  0x2b   :  { %1993 = vmatpush3.bf16.msra.mxu0 %v1990_v3  ;;  %1854 = vmatprep.mubr.f32.mxu0 %v2318_v11  ;;  %v2047_v13 = vpack.c.bf16 %v2320_v12, %v2318_v11  ;;  %v2327_v15 = vld [vmem:[#allocation2 + $0x18] sm:$0xff]  ;;  %v2329_v16 = vld [vmem:[#allocation2 + $0x20] sm:$0xff]  ;;  %v2333_v18 = vld [vmem:[#allocation2 + $0x28] sm:$0xff] }
  0x2c   :  { %1995 = vmatprep.subr.bf16.mxu0 %v1994_v5  ;;  %v2050_v17 = vpack.c.bf16 %v2327_v15, %v2325_v14  ;;  %v2335_v19 = vld [vmem:[#allocation2 + $0x30] sm:$0xff]  ;;  %v2337_v20 = vld [vmem:[#allocation2 + $0x38] sm:$0xff]  ;;  %v76_v21 = vld [vmem:[#allocation5 + $0x40] sm:$0xff]  ;;  %v2053_v22 = vpack.c.bf16 %v2333_v18, %v2329_v16  ;;  %v884_v55 = vunpack.c.0.s8 %v883_v53 }
  0x2d   :  { %v2056_v23 = vpack.c.bf16 %v2337_v20, %v2335_v19  ;;  %v2343_v24 = vld [vmem:[#allocation2 + $0x40] sm:$0xff]  ;;  %v2345_v25 = vld [vmem:[#allocation2 + $0x48] sm:$0xff]  ;;  %v2347_v26 = vld [vmem:[#allocation2 + $0x50] sm:$0xff] }
  0x2e   :  { %v2059_v28 = vpack.c.bf16 %v2345_v25, %v2343_v24  ;;  %v2351_v29 = vld [vmem:[#allocation2 + $0x58] sm:$0xff]  ;;  %v2353_v30 = vld [vmem:[#allocation2 + $0x60] sm:$0xff]  ;;  %v2355_v31 = vld [vmem:[#allocation2 + $0x68] sm:$0xff]  ;;  %v887_v57 = vsub.s32 %v884_v55, %v2389_v54 }
  0x2f   :  { %1997 = vmatpush3.bf16.msra.mxu0 %v1994_v5  ;;  %v77_v32 = vld [vmem:[#allocation5 + $0x48] sm:$0xff]  ;;  %v2062_v33 = vpack.c.bf16 %v2351_v29, %v2347_v26  ;;  %v2065_v34 = vpack.c.bf16 %v2355_v31, %v2353_v30  ;;  %v2361_v35 = vld [vmem:[#allocation2 + $0x70] sm:$0xff]  ;;  %v2363_v36 = vld [vmem:[#allocation2 + $0x78] sm:$0xff] }
  0x30   :  { %1999 = vmatprep.subr.bf16.mxu0 %v1998_v9  ;;  %v2068_v37 = vpack.c.bf16 %v2363_v36, %v2361_v35  ;;  %v2006_v38 = vpack.c.bf16 %v77_v32, %v76_v21  ;;  %v78_v39 = vld [vmem:[#allocation5 + $0x50] sm:$0xff]  ;;  %v79_v40 = vld [vmem:[#allocation5 + $0x58] sm:$0xff]  ;;  %v80_v42 = vld [vmem:[#allocation5 + $0x60] sm:$0xff] }
  0x31   :  { %v2010_v41 = vpack.c.bf16 %v79_v40, %v78_v39  ;;  %v81_v43 = vld [vmem:[#allocation5 + $0x68] sm:$0xff]  ;;  %v82_v45 = vld [vmem:[#allocation5 + $0x70] sm:$0xff]  ;;  %v83_v46 = vld [vmem:[#allocation5 + $0x78] sm:$0xff] }
  0x32   :  { %v2014_v44 = vpack.c.bf16 %v81_v43, %v80_v42  ;;  %v2018_v47 = vpack.c.bf16 %v83_v46, %v82_v45  ;;  %v880_v56 = vld [vmem:[%s2618_s0] sm:$0xff] }
  0x33   :  { %2001 = vmatpush3.bf16.msra.mxu0 %v1998_v9  ;;  %v888_v58 = vrot.slane %v880_v56, %v887_v57  ;;  %v881_v59 = vcombine.high %v880_v56, %v880_v56  ;;  %v1726_v7 = vld [vmem:[%s2620_s2] ss:$0 sm:$0xff]  ;;  %v1729_v46 = vld [vmem:[%s2620_s2 + $0x3] ss:$0 sm:$0xff] }
  0x34   :  { %2003 = vmatprep.subr.bf16.mxu0 %v2002_v27 }
  0x35   :  { %v904_v60 = vrot.slane %v888_v58, %v887_v57  ;;  %v896_v61 = vcombine.high %v888_v58, %v888_v58  ;;  %v895_v0 = vrot.slane %v881_v59, %v887_v57 }
  0x37   :  { %2005 = vmatpush3.bf16.msra.mxu0 %v2002_v27  ;;  %931 = vperm.xlu0 %2083, %v904_v60   ;;  %v918_v62 = vrot.slane %v896_v61, %v887_v57  ;;  %v926_v63 = vcombine.high %v904_v60, %v904_v60  ;;  %v897_v2 = vcombine.high %v895_v0, %v895_v0  ;;  %v1727_v27 = vld [vmem:[%s2620_s2 + $0x1] ss:$0 sm:$0xff] }
  0x38   :  { %2007 = vmatprep.subr.bf16.mxu0 %v2006_v38  ;;  %v911_v3 = vrot.slane %v895_v0, %v887_v57 }
  0x39   :  { %945 = vperm.xlu1 %2084, %v926_v63   ;;  %v928_v1 = vcombine.high %v918_v62, %v918_v62  ;;  %v925_v4 = vrot.slane %v897_v2, %v887_v57  ;;  %v1730_v57 = vld [vmem:[%s2620_s2 + $0x4] ss:$0 sm:$0xff] }
  0x3a   :  { %v927_v5 = vcombine.high %v911_v3, %v911_v3 }
  0x3b   :  { %2009 = vmatpush3.bf16.msra.mxu0 %v2006_v38  ;;  %938 = vperm.xlu0 %2083, %v918_v62   ;;  %v929_v6 = vcombine.high %v925_v4, %v925_v4 }
  0x3c   :  { %2011 = vmatprep.subr.bf16.mxu0 %v2010_v41 }
  0x3d   :  { %952 = vperm.xlu1 %2084, %v928_v1   ;;  %v1731_v1 = vld [vmem:[%s2620_s2 + $0x5] ss:$0 sm:$0xff] }
  0x3f   :  { %2013 = vmatpush3.bf16.msra.mxu0 %v2010_v41  ;;  %959 = vperm.xlu0 %2083, %v911_v3   ;;  %v1728_v41 = vld [vmem:[%s2620_s2 + $0x2] ss:$0 sm:$0xff] }
  0x40   :  { %2015 = vmatprep.subr.bf16.mxu0 %v2014_v44 }
  0x41   :  { %966 = vperm.xlu1 %2084, %v925_v4  }
  0x43   :  { %2017 = vmatpush3.bf16.msra.mxu0 %v2014_v44  ;;  %973 = vperm.xlu0 %2083, %v927_v5  }
  0x44   :  { %2019 = vmatprep.subr.bf16.mxu0 %v2018_v47 }
  0x45   :  { %980 = vperm.xlu1 %2084, %v929_v6  }
  0x47   :  { %2021 = vmatpush3.bf16.msra.mxu0 %v2018_v47 }
  0x48   :  { %2043 = vmatprep.subr.bf16.mxu0 %v2250_v48 }
  0x4a   :  { %1855 = vmatmul.mubr.f32.vlgmr.msra.gmra.mrb[0].mxu0 %v2320_v12 }
  0x4b   :  { %1857 = vmatprep.mubr.f32.mxu0 %v2325_v14 }
  0x4e   :  { %1858 = vmatmul.mubr.f32.gmra.mrb[2].mxu0 %v2327_v15 }
  0x4f   :  { %1860 = vmatprep.mubr.f32.mxu0 %v2329_v16  ;;  %v935_v16 = vsub.s32 0, %v2389_v54 }
  0x52   :  { %1861 = vmatmul.mubr.f32.gmra.mrb[4].mxu0 %v2333_v18 }
  0x53   :  { %1863 = vmatprep.mubr.f32.mxu0 %v2335_v19 }
  0x56   :  { %1864 = vmatmul.mubr.f32.gmra.mrb[6].mxu0 %v2337_v20 }
  0x57   :  { %1866 = vmatprep.mubr.f32.mxu0 %v2343_v24 }
  0x5a   :  { %1867 = vmatmul.mubr.f32.gmra.mrb[8].mxu0 %v2345_v25 }
  0x5b   :  { %1869 = vmatprep.mubr.f32.mxu0 %v2347_v26 }
  0x5e   :  { %1870 = vmatmul.mubr.f32.gmra.mrb[10].mxu0 %v2351_v29 }
  0x5f   :  { %1872 = vmatprep.mubr.f32.mxu0 %v2353_v30 }
  0x62   :  { %1873 = vmatmul.mubr.f32.gmra.mrb[12].mxu0 %v2355_v31 }
  0x63   :  { %1875 = vmatprep.mubr.f32.mxu0 %v2361_v35 }
  0x66   :  { %1876 = vmatmul.mubr.f32.gmra.mrb[14].mxu0 %v2363_v36 }
  0x67   :  { %1931 = vmatprep.mubr.msk.f32.mxu0 %vm2251_vm0, %v2252_v49 }
  0xb6   :  { %v932_v18 = vpop.permute.xlu0 %931 }
  0xb8   :  { %v946_v12 = vpop.permute.xlu1 %945 }
  0xbc   :  { %v953_v54 = vpop.permute.xlu1 %952 }
 0x11d   :  { %v1856_v8 = vpop.f32.mrb[0].mxu0 }
 0x11e   :  { %v286_v9 = vadd.f32 %v1856_v8, %v1726_v7  ;;  %v150_v10 = vpop.f32.mrb[1].mxu0 }
 0x11f   :  { %v285_v21 = vadd.f32 %v1726_v7, %v150_v10  ;;  %v2417_v7 = vld [vmem:[%s2622_s4] sm:$0x1]  ;;  %v1732_v10 = vld [vmem:[%s2620_s2 + $0x6] ss:$0 sm:$0xff] }
 0x120   :  { %2086 = vtanh.f32 %v286_v9 }
 0x121   :  { %2088 = vtanh.f32 %v285_v21  ;;  %v1859_v32 = vpop.f32.mrb[2].mxu0 }
 0x122   :  { %v288_v38 = vadd.f32 %v1859_v32, %v1727_v27  ;;  %v160_v39 = vpop.f32.mrb[3].mxu0 }
 0x123   :  { %v287_v40 = vadd.f32 %v1727_v27, %v160_v39 }
 0x124   :  { %2090 = vtanh.f32 %v288_v38 }
 0x125   :  { %2092 = vtanh.f32 %v287_v40  ;;  %v1862_v42 = vpop.f32.mrb[4].mxu0 }
 0x126   :  { %v290_v43 = vadd.f32 %v1862_v42, %v1728_v41  ;;  %v170_v44 = vpop.f32.mrb[5].mxu0  ;;  %v1733_v42 = vld [vmem:[%s2620_s2 + $0x7] ss:$0 sm:$0xff]  ;;  %s2255_s2 = smov [#allocation8]  }
 0x127   :  { %v289_v45 = vadd.f32 %v1728_v41, %v170_v44  ;;  %s1709_s15 = sshll.u32 %s2255_s2, 4  ;;  %s1710_s15 = int_to_ptr.vmem [resolvable:$true] %s1709_s15 }
 0x128   :  { %2094 = vtanh.f32 %v290_v43  ;;  %s2194_s16 = scalar_lea.vmem %s1710_s15, 128  ;;  %p2199_p3 = scmp.lt.s32.totalorder %s1710_s15, %s1710_s15 }
 0x129   :  { %2096 = vtanh.f32 %v289_v45  ;;  %v1865_v47 = vpop.f32.mrb[6].mxu0  ;;  %p2195_p2 = scmp.ne.s32.totalorder %s1710_s15, %s2194_s16  ;;  %p2200_p4 = scmp.lt.s32.totalorder %s2194_s16, %s2194_s16 }
 0x12a   :  { %v2087_v51 = vpop.eup %2086  ;;  %v292_v52 = vadd.f32 %v1865_v47, %v1729_v46  ;;  %v180_v53 = vpop.f32.mrb[7].mxu0 }
 0x12b   :  { %v2089_v55 = vpop.eup %2088  ;;  %v291_v56 = vadd.f32 %v1729_v46, %v180_v53  ;;  %p2201_p5 = por %p2200_p4, %p2199_p3 }
 0x12c   :  { %2098 = vtanh.f32 %v292_v52  ;;  %v2023_v58 = vpack.c.bf16 %v2087_v51, %v2089_v55 }
 0x12d   :  { %2100 = vtanh.f32 %v291_v56  ;;  %v1868_v59 = vpop.f32.mrb[8].mxu0  ;;  %p2202_p6 = pnand %p2201_p5, %p2195_p2 }
 0x12e   :  { %v2091_v60 = vpop.eup %2090  ;;  %v294_v61 = vadd.f32 %v1868_v59, %v1730_v57  ;;  %v190_v62 = vpop.f32.mrb[9].mxu0  ;;  %2024 = vmatpush3.bf16.xpose.msra.mxu1 %v2023_v58 }
 0x12f   :  { %v2093_v63 = vpop.eup %2092  ;;  %v293_v0 = vadd.f32 %v1730_v57, %v190_v62  ;;  %2025 = vmatprep.subr.bf16.mxu1 %v2250_v48 }
 0x130   :  { %2102 = vtanh.f32 %v294_v61  ;;  %v2026_v2 = vpack.c.bf16 %v2091_v60, %v2093_v63 }
 0x131   :  { %2104 = vtanh.f32 %v293_v0  ;;  %v1871_v3 = vpop.f32.mrb[10].mxu0  ;;  %v936_v0 = vrot.slane %v932_v18, %v935_v16 }
 0x132   :  { %v2095_v4 = vpop.eup %2094  ;;  %v296_v5 = vadd.f32 %v1871_v3, %v1731_v1  ;;  %v200_v6 = vpop.f32.mrb[11].mxu0 }
 0x133   :  { %v2097_v8 = vpop.eup %2096  ;;  %v295_v9 = vadd.f32 %v1731_v1, %v200_v6 }
 0x134   :  { %2106 = vtanh.f32 %v296_v5  ;;  %v2029_v21 = vpack.c.bf16 %v2095_v4, %v2097_v8  ;;  %v957_v5 = vrot.slane %v953_v54, %v935_v16 }
 0x135   :  { %2108 = vtanh.f32 %v295_v9  ;;  %v1874_v27 = vpop.f32.mrb[12].mxu0  ;;  %1883 = vmatmul.mubr.f32.vlgmr.msra.gmra.mrb[0].mxu1 %v2417_v7  ;;  %v967_v9 = vpop.permute.xlu1 %966 }
 0x136   :  { %v2099_v32 = vpop.eup %2098  ;;  %v298_v38 = vadd.f32 %v1874_v27, %v1732_v10  ;;  %v210_v39 = vpop.f32.mrb[13].mxu0  ;;  %2027 = vmatpush3.bf16.xpose.msra.mxu1 %v2026_v2  ;;  %1889 = vmatprep.mubr.msk.f32.mxu1 %vm2251_vm0, %v2252_v49 }
 0x137   :  { %v2101_v40 = vpop.eup %2100  ;;  %v297_v41 = vadd.f32 %v1732_v10, %v210_v39  ;;  %2028 = vmatprep.subr.bf16.mxu1 %v2250_v48  ;;  %v939_v2 = vpop.permute.xlu0 %938 }
 0x138   :  { %2110 = vtanh.f32 %v298_v38  ;;  %v2032_v43 = vpack.c.bf16 %v2099_v32, %v2101_v40  ;;  %v943_v3 = vrot.slane %v939_v2, %v935_v16  ;;  %v971_v32 = vrot.slane %v967_v9, %v935_v16 }
 0x139   :  { %2112 = vtanh.f32 %v297_v41  ;;  %v1877_v44 = vpop.f32.mrb[14].mxu0  ;;  %v981_v38 = vpop.permute.xlu1 %980 }
 0x13a   :  { %v2103_v45 = vpop.eup %2102  ;;  %v300_v46 = vadd.f32 %v1877_v44, %v1733_v42  ;;  %v220_v47 = vpop.f32.mrb[15].mxu0  ;;  %v985_v39 = vrot.slane %v981_v38, %v935_v16 }
 0x13b   :  { %v2105_v51 = vpop.eup %2104  ;;  %v299_v52 = vadd.f32 %v1733_v42, %v220_v47  ;;  %v960_v6 = vpop.permute.xlu0 %959 }
 0x13c   :  { %2114 = vtanh.f32 %v300_v46  ;;  %v2035_v53 = vpack.c.bf16 %v2103_v45, %v2105_v51 }
 0x13d   :  { %2116 = vtanh.f32 %v299_v52  ;;  %1890 = vmatmul.mubr.f32.vlgmr.msra.gmra.mrb[2].mxu1 %v2417_v7 }
 0x13e   :  { %v2107_v55 = vpop.eup %2106  ;;  %2030 = vmatpush3.bf16.xpose.msra.mxu1 %v2029_v21  ;;  %1896 = vmatprep.mubr.msk.f32.mxu1 %vm2251_vm0, %v2252_v49 }
 0x13f   :  { %v2109_v56 = vpop.eup %2108  ;;  %2031 = vmatprep.subr.bf16.mxu1 %v2250_v48  ;;  %v974_v8 = vpop.permute.xlu0 %973 }
 0x140   :  { %v2038_v57 = vpack.c.bf16 %v2107_v55, %v2109_v56  ;;  %v978_v10 = vrot.slane %v974_v8, %v935_v16 }
 0x142   :  { %v2111_v58 = vpop.eup %2110 }
 0x143   :  { %v2113_v59 = vpop.eup %2112 }
 0x144   :  { %v2041_v60 = vpack.c.bf16 %v2111_v58, %v2113_v59 }
 0x145   :  { %1897 = vmatmul.mubr.f32.vlgmr.msra.gmra.mrb[4].mxu1 %v2417_v7 }
 0x146   :  { %v2115_v61 = vpop.eup %2114  ;;  %2033 = vmatpush3.bf16.xpose.msra.mxu1 %v2032_v43  ;;  %1903 = vmatprep.mubr.msk.f32.mxu1 %vm2251_vm0, %v2252_v49 }
 0x147   :  { %v2117_v62 = vpop.eup %2116  ;;  %2034 = vmatprep.subr.bf16.mxu1 %v2250_v48 }
 0x148   :  { %v2044_v63 = vpack.c.bf16 %v2115_v61, %v2117_v62 }
 0x14a   :  { %2045 = vmatpush3.bf16.xpose.msra.mxu0 %v2044_v63 }
 0x14b   :  { %2052 = vmatprep.subr.bf16.mxu0 %v2250_v48 }
 0x14d   :  { %1904 = vmatmul.mubr.f32.vlgmr.msra.gmra.mrb[6].mxu1 %v2417_v7 }
 0x14e   :  { %2036 = vmatpush3.bf16.xpose.msra.mxu1 %v2035_v53  ;;  %1910 = vmatprep.mubr.msk.f32.mxu1 %vm2251_vm0, %v2252_v49 }
 0x14f   :  { %2037 = vmatprep.subr.bf16.mxu1 %v2250_v48 }
 0x151   :  { %1932 = vmatmul.mubr.f32.vlgmr.msra.gmra.mrb[16].mxu0 %v2417_v7 }
 0x152   :  { %2054 = vmatpush3.bf16.msra.mxu0 %v2053_v22  ;;  %1952 = vmatprep.mubr.msk.f32.mxu0 %vm2251_vm0, %v2252_v49  ;;  %v879_v22 = vand.u32 127, %v878_v50 }
 0x153   :  { %2058 = vmatprep.subr.bf16.mxu0 %v2250_v48 }
 0x154   :  { %vm2466_vm1 = vcmp.lt.s32.totalorder %v879_v22, %v936_v0  ;;  %vm2470_vm2 = vcmp.lt.s32.totalorder %v879_v22, %v943_v3  ;;  %vm2478_vm4 = vcmp.lt.s32.totalorder %v879_v22, %v957_v5  ;;  %vm2486_vm6 = vcmp.lt.s32.totalorder %v879_v22, %v978_v10 }
 0x155   :  { %1911 = vmatmul.mubr.f32.vlgmr.msra.gmra.mrb[8].mxu1 %v2417_v7  ;;  %vm2490_vm7 = vcmp.lt.s32.totalorder %v879_v22, %v971_v32  ;;  %vm2494_vm8 = vcmp.lt.s32.totalorder %v879_v22, %v985_v39 }
 0x156   :  { %2039 = vmatpush3.bf16.xpose.msra.mxu1 %v2038_v57  ;;  %1917 = vmatprep.mubr.msk.f32.mxu1 %vm2251_vm0, %v2252_v49 }
 0x157   :  { %2040 = vmatprep.subr.bf16.mxu1 %v2250_v48 }
 0x15d   :  { %1918 = vmatmul.mubr.f32.vlgmr.msra.gmra.mrb[10].mxu1 %v2417_v7 }
 0x15e   :  { %2042 = vmatpush3.bf16.xpose.msra.mxu1 %v2041_v60  ;;  %1924 = vmatprep.mubr.msk.f32.mxu1 %vm2251_vm0, %v2252_v49 }
 0x15f   :  { %2046 = vmatprep.subr.bf16.mxu1 %v2250_v48 }
 0x165   :  { %1925 = vmatmul.mubr.f32.vlgmr.msra.gmra.mrb[12].mxu1 %v2417_v7  ;;  %v964_v7 = vrot.slane %v960_v6, %v935_v16 }
 0x166   :  { %2048 = vmatpush3.bf16.msra.mxu1 %v2047_v13  ;;  %1938 = vmatprep.mubr.msk.f32.mxu1 %vm2251_vm0, %v2252_v49  ;;  %v950_v13 = vrot.slane %v946_v12, %v935_v16 }
 0x167   :  { %2049 = vmatprep.subr.bf16.mxu1 %v2250_v48  ;;  %vm2482_vm5 = vcmp.lt.s32.totalorder %v879_v22, %v964_v7 }
 0x168   :  { %vm2474_vm3 = vcmp.lt.s32.totalorder %v879_v22, %v950_v13 }
 0x208   :  { %v384_v42 = vpop.f32.mrb[0].mxu1 }
 0x209   :  { %v994_v43 = vsel %vm2466_vm1, %v384_v42, -inf  ;;  %v1884_v44 = vpop.f32.mrb[1].mxu1 }
 0x20a   :  { %v1003_v45 = vsel %vm1002_vm9, %v994_v43, -inf }
 0x20b   :  { %1004 = vmax.xlane.f32.xlu0 %v1003_v45 }
 0x210   :  { %v454_v46 = vpop.f32.mrb[2].mxu1 }
 0x211   :  { %v995_v47 = vsel %vm2470_vm2, %v454_v46, -inf  ;;  %v1891_v51 = vpop.f32.mrb[3].mxu1 }
 0x212   :  { %v1006_v52 = vsel %vm1002_vm9, %v995_v47, -inf }
 0x213   :  { %1007 = vmax.xlane.f32.xlu1 %v1006_v52 }
 0x218   :  { %v524_v53 = vpop.f32.mrb[4].mxu1 }
 0x219   :  { %v996_v55 = vsel %vm2474_vm3, %v524_v53, -inf  ;;  %v1898_v56 = vpop.f32.mrb[5].mxu1 }
 0x21a   :  { %v1009_v57 = vsel %vm1002_vm9, %v996_v55, -inf }
 0x21b   :  { %1010 = vmax.xlane.f32.xlu0 %v1009_v57 }
 0x220   :  { %v594_v58 = vpop.f32.mrb[6].mxu1 }
 0x221   :  { %v997_v59 = vsel %vm2478_vm4, %v594_v58, -inf  ;;  %v1905_v60 = vpop.f32.mrb[7].mxu1 }
 0x222   :  { %v1012_v61 = vsel %vm1002_vm9, %v997_v59, -inf }
 0x223   :  { %1013 = vmax.xlane.f32.xlu0 %v1012_v61 }
 0x224   :  { %v874_v62 = vpop.f32.mrb[16].mxu0 }
 0x225   :  { %v1001_v63 = vsel %vm2494_vm8, %v874_v62, -inf  ;;  %v1933_v16 = vpop.f32.mrb[17].mxu0 }
 0x226   :  { %v1024_v13 = vsel %vm1002_vm9, %v1001_v63, -inf }
 0x228   :  { %v664_v18 = vpop.f32.mrb[8].mxu1 }
 0x229   :  { %v998_v22 = vsel %vm2482_vm5, %v664_v18, -inf  ;;  %v1912_v0 = vpop.f32.mrb[9].mxu1 }
 0x22a   :  { %v1015_v1 = vsel %vm1002_vm9, %v998_v22, -inf }
 0x22b   :  { %1016 = vmax.xlane.f32.xlu1 %v1015_v1 }
 0x230   :  { %v734_v2 = vpop.f32.mrb[10].mxu1 }
 0x231   :  { %v999_v3 = vsel %vm2490_vm7, %v734_v2, -inf  ;;  %v1919_v11 = vpop.f32.mrb[11].mxu1 }
 0x232   :  { %v1018_v12 = vsel %vm1002_vm9, %v999_v3, -inf }
 0x233   :  { %1019 = vmax.xlane.f32.xlu0 %v1018_v12 }
 0x237   :  { %1025 = vmax.xlane.f32.xlu0 %v1024_v13 }
 0x238   :  { %v804_v4 = vpop.f32.mrb[12].mxu1 }
 0x239   :  { %v1000_v54 = vsel %vm2486_vm6, %v804_v4, -inf  ;;  %v1926_v5 = vpop.f32.mrb[13].mxu1 }
 0x23a   :  { %v1021_v50 = vsel %vm1002_vm9, %v1000_v54, -inf }
 0x23b   :  { %1022 = vmax.xlane.f32.xlu1 %v1021_v50 }
 0x298   :  { %v1005_v6 = vpop.xlane.xlu0 %1004 }
 0x299   :  { %v1027_v7 = vsub.f32 %v994_v43, %v1005_v6 }
 0x29b   :  { %v1035_v8 = vmul.f32 1.442695, %v1027_v7 }
 0x29d   :  { %2118 = vpow2.f32 %v1035_v8 }
 0x2a0   :  { %v1008_v9 = vpop.xlane.xlu1 %1007 }
 0x2a1   :  { %v1028_v10 = vsub.f32 %v995_v47, %v1008_v9 }
 0x2a3   :  { %v1037_v21 = vmul.f32 1.442695, %v1028_v10 }
 0x2a5   :  { %2120 = vpow2.f32 %v1037_v21 }
 0x2a7   :  { %v2119_v32 = vpop.eup %2118 }
 0x2a8   :  { %v1011_v38 = vpop.xlane.xlu0 %1010  ;;  %v1051_v39 = vsel %vm1002_vm9, %v2119_v32, 0.0 }
 0x2a9   :  { %v1029_v40 = vsub.f32 %v996_v55, %v1011_v38  ;;  %1052 = vadd.xlane.f32.xlu1 %v1051_v39 }
 0x2ab   :  { %v1039_v27 = vmul.f32 1.442695, %v1029_v40 }
 0x2ad   :  { %2122 = vpow2.f32 %v1039_v27 }
 0x2af   :  { %v2121_v41 = vpop.eup %2120 }
 0x2b0   :  { %v1014_v42 = vpop.xlane.xlu0 %1013  ;;  %v1054_v44 = vsel %vm1002_vm9, %v2121_v41, 0.0 }
 0x2b1   :  { %v1030_v45 = vsub.f32 %v997_v59, %v1014_v42  ;;  %1055 = vadd.xlane.f32.xlu0 %v1054_v44 }
 0x2b3   :  { %v1041_v43 = vmul.f32 1.442695, %v1030_v45 }
 0x2b5   :  { %2124 = vpow2.f32 %v1041_v43 }
 0x2b7   :  { %v2123_v46 = vpop.eup %2122 }
 0x2b8   :  { %v1017_v47 = vpop.xlane.xlu1 %1016  ;;  %v1057_v51 = vsel %vm1002_vm9, %v2123_v46, 0.0 }
 0x2b9   :  { %v1031_v52 = vsub.f32 %v998_v22, %v1017_v47  ;;  %1058 = vadd.xlane.f32.xlu1 %v1057_v51 }
 0x2bb   :  { %v1043_v53 = vmul.f32 1.442695, %v1031_v52 }
 0x2bd   :  { %2126 = vpow2.f32 %v1043_v53 }
 0x2bf   :  { %v2125_v55 = vpop.eup %2124 }
 0x2c0   :  { %v1020_v56 = vpop.xlane.xlu0 %1019  ;;  %v1060_v57 = vsel %vm1002_vm9, %v2125_v55, 0.0 }
 0x2c1   :  { %v1032_v58 = vsub.f32 %v999_v3, %v1020_v56  ;;  %1061 = vadd.xlane.f32.xlu0 %v1060_v57 }
 0x2c3   :  { %v1045_v60 = vmul.f32 1.442695, %v1032_v58 }
 0x2c4   :  { %v1026_v61 = vpop.xlane.xlu0 %1025 }
 0x2c5   :  { %2128 = vpow2.f32 %v1045_v60  ;;  %v1034_v59 = vsub.f32 %v1001_v63, %v1026_v61 }
 0x2c7   :  { %v2127_v62 = vpop.eup %2126  ;;  %v1049_v16 = vmul.f32 1.442695, %v1034_v59 }
 0x2c8   :  { %v1023_v18 = vpop.xlane.xlu1 %1022  ;;  %v1063_v0 = vsel %vm1002_vm9, %v2127_v62, 0.0 }
 0x2c9   :  { %2130 = vpow2.f32 %v1049_v16  ;;  %v1033_v22 = vsub.f32 %v1000_v54, %v1023_v18  ;;  %1064 = vadd.xlane.f32.xlu1 %v1063_v0 }
 0x2cb   :  { %v1047_v1 = vmul.f32 1.442695, %v1033_v22 }
 0x2cd   :  { %2132 = vpow2.f32 %v1047_v1 }
 0x2cf   :  { %v2129_v2 = vpop.eup %2128 }
 0x2d0   :  { %v1066_v11 = vsel %vm1002_vm9, %v2129_v2, 0.0 }
 0x2d1   :  { %1067 = vadd.xlane.f32.xlu0 %v1066_v11 }
 0x2d3   :  { %v2528_v3 = vpop.eup %2130 }
 0x2d4   :  { %v1072_v12 = vsel %vm1002_vm9, %v2528_v3, 0.0 }
 0x2d5   :  { %1073 = vadd.xlane.f32.xlu0 %v1072_v12 }
 0x2d7   :  { %v2532_v63 = vpop.eup %2132 }
 0x2d8   :  { %v1069_v13 = vsel %vm1002_vm9, %v2532_v63, 0.0 }
 0x2d9   :  { %1070 = vadd.xlane.f32.xlu1 %v1069_v13 }
 0x336   :  { %v1053_v4 = vpop.xlane.xlu1 %1052 }
 0x337   :  { %2134 = vrcp.f32 %v1053_v4 }
 0x33e   :  { %v1056_v54 = vpop.xlane.xlu0 %1055 }
 0x33f   :  { %2136 = vrcp.f32 %v1056_v54 }
 0x341   :  { %v2135_v5 = vpop.eup %2134 }
 0x342   :  { %v1076_v50 = vmul.f32 %v2135_v5, %v2119_v32 }
 0x344   :  { %1684 = vst.msk [vmem:[#allocation8] sm:$0x1] %vm1002_vm9, %v1076_v50  ;;  %1939 = vmatmul.mubr.msk.f32.vlgmr.msra.gmra.mrb[14].mxu1 %vm1091_vm10, %v1076_v50 }
 0x345   :  { %2051 = vmatpush3.bf16.msra.mxu1 %v2050_v17  ;;  %1945 = vmatprep.mubr.msk.f32.mxu1 %vm2251_vm0, %v2252_v49 }
 0x346   :  { %v1059_v6 = vpop.xlane.xlu1 %1058  ;;  %2055 = vmatprep.subr.bf16.mxu1 %v2250_v48 }
 0x347   :  { %2138 = vrcp.f32 %v1059_v6 }
 0x349   :  { %v2137_v7 = vpop.eup %2136 }
 0x34a   :  { %v1078_v8 = vmul.f32 %v2137_v7, %v2121_v41 }
 0x34c   :  { %1685 = vst.msk [vmem:[#allocation8 + $0x1] sm:$0x1] %vm1002_vm9, %v1078_v8  ;;  %1946 = vmatmul.mubr.msk.f32.vlgmr.msra.gmra.mrb[16].mxu1 %vm1091_vm10, %v1078_v8 }
 0x34d   :  { %2057 = vmatpush3.bf16.msra.mxu1 %v2056_v23  ;;  %1959 = vmatprep.mubr.msk.f32.mxu1 %vm2251_vm0, %v2252_v49 }
 0x34e   :  { %v1062_v14 = vpop.xlane.xlu0 %1061  ;;  %2061 = vmatprep.subr.bf16.mxu1 %v2250_v48 }
 0x34f   :  { %2140 = vrcp.f32 %v1062_v14 }
 0x351   :  { %v2139_v15 = vpop.eup %2138 }
 0x352   :  { %v1080_v17 = vmul.f32 %v2139_v15, %v2123_v46 }
 0x354   :  { %1686 = vst.msk [vmem:[#allocation8 + $0x2] sm:$0x1] %vm1002_vm9, %v1080_v17  ;;  %1953 = vmatmul.mubr.msk.f32.vlgmr.msra.gmra.mrb[18].mxu0 %vm1091_vm10, %v1080_v17 }
 0x355   :  { %2060 = vmatpush3.bf16.msra.mxu0 %v2059_v28  ;;  %1966 = vmatprep.mubr.msk.f32.mxu0 %vm2251_vm0, %v2252_v49 }
 0x356   :  { %v1065_v19 = vpop.xlane.xlu1 %1064  ;;  %2064 = vmatprep.subr.bf16.mxu0 %v2250_v48 }
 0x357   :  { %2142 = vrcp.f32 %v1065_v19 }
 0x359   :  { %v2141_v20 = vpop.eup %2140 }
 0x35a   :  { %v1082_v23 = vmul.f32 %v2141_v20, %v2125_v55 }
 0x35c   :  { %1687 = vst.msk [vmem:[#allocation8 + $0x3] sm:$0x1] %vm1002_vm9, %v1082_v23  ;;  %1960 = vmatmul.mubr.msk.f32.vlgmr.msra.gmra.mrb[18].mxu1 %vm1091_vm10, %v1082_v23 }
 0x35d   :  { %2063 = vmatpush3.bf16.msra.mxu1 %v2062_v33  ;;  %1973 = vmatprep.mubr.msk.f32.mxu1 %vm2251_vm0, %v2252_v49 }
 0x35e   :  { %v1068_v24 = vpop.xlane.xlu0 %1067  ;;  %2067 = vmatprep.subr.bf16.mxu1 %v2250_v48 }
 0x35f   :  { %2144 = vrcp.f32 %v1068_v24 }
 0x361   :  { %v2143_v25 = vpop.eup %2142 }
 0x362   :  { %v1084_v28 = vmul.f32 %v2143_v25, %v2127_v62  ;;  %v1074_v9 = vpop.xlane.xlu0 %1073 }
 0x363   :  { %2146 = vrcp.f32 %v1074_v9 }
 0x364   :  { %1688 = vst.msk [vmem:[#allocation8 + $0x4] sm:$0x1] %vm1002_vm9, %v1084_v28  ;;  %1967 = vmatmul.mubr.msk.f32.vlgmr.msra.gmra.mrb[20].mxu0 %vm1091_vm10, %v1084_v28 }
 0x365   :  { %2066 = vmatpush3.bf16.msra.mxu0 %v2065_v34  ;;  %1980 = vmatprep.mubr.msk.f32.mxu0 %vm2251_vm0, %v2252_v49 }
 0x366   :  { %v1071_v26 = vpop.xlane.xlu1 %1070 }
 0x367   :  { %2148 = vrcp.f32 %v1071_v26 }
 0x369   :  { %v2145_v29 = vpop.eup %2144 }
 0x36a   :  { %v1086_v33 = vmul.f32 %v2145_v29, %v2129_v2 }
 0x36c   :  { %1689 = vst.msk [vmem:[#allocation8 + $0x5] sm:$0x1] %vm1002_vm9, %v1086_v33  ;;  %1974 = vmatmul.mubr.msk.f32.vlgmr.msra.gmra.mrb[20].mxu1 %vm1091_vm10, %v1086_v33 }
 0x36d   :  { %v2147_v48 = vpop.eup %2146  ;;  %2069 = vmatpush3.bf16.msra.mxu1 %v2068_v37  ;;  %1987 = vmatprep.mubr.msk.f32.mxu1 %vm2251_vm0, %v2252_v49 }
 0x36e   :  { %v1090_v30 = vmul.f32 %v2147_v48, %v2528_v3 }
 0x370   :  { %1691 = vst.msk [vmem:[#allocation8 + $0x7] sm:$0x1] %vm1002_vm9, %v1090_v30  ;;  %1988 = vmatmul.mubr.msk.f32.vlgmr.msra.gmra.mrb[22].mxu1 %vm1091_vm10, %v1090_v30 }
 0x371   :  { %v2149_v31 = vpop.eup %2148 }
 0x372   :  { %v1088_v34 = vmul.f32 %v2149_v31, %v2532_v63 }
 0x374   :  { %1690 = vst.msk [vmem:[#allocation8 + $0x6] sm:$0x1] %vm1002_vm9, %v1088_v34  ;;  %1981 = vmatmul.mubr.msk.f32.vlgmr.msra.gmra.mrb[22].mxu0 %vm1091_vm10, %v1088_v34 }
 0x375   :  { %2205 = shalt.err (!%p2202_p6)
}
 0x376   :  { %s2206_s19 = scalar_lea.hbm %s2624_s6, 128 }
 0x377   :  { %p2207_p7 = scmp.ne.s32.totalorder %s2624_s6, %s2206_s19  ;;  %p2210_p8 = scmp.lt.u32.totalorder %s2206_s19, %s2624_s6 }
 0x379   :  { %p2212_p9 = pnand %p2210_p8, %p2207_p7 }
 0x37b   :  { %2215 = shalt.err (!%p2212_p9)
}
 0x37c   :  { %s2256_s22 = smov 16   ;;  %s2257_s0 = smov 1  }
 0x37d   :  { %1715 = dma.vmem_to_hbm [thread:$0]  %s1710_s15, 128, %s2624_s6, [#allocation9], %s2256_s22, %s2256_s22, %s2257_s0  }
 0x37e   :  { %s2258_s6 = smov [#allocation7]  }
 0x37f   :  { %s1697_s25 = sshll.u32 %s2258_s6, 4  ;;  %s1698_s25 = int_to_ptr.vmem [resolvable:$true] %s1697_s25 }
 0x380   :  { %s2216_s26 = scalar_lea.vmem %s1698_s25, 128  ;;  %p2221_p11 = scmp.lt.s32.totalorder %s1698_s25, %s1698_s25 }
 0x381   :  { %p2217_p10 = scmp.ne.s32.totalorder %s1698_s25, %s2216_s26  ;;  %p2222_p12 = scmp.lt.s32.totalorder %s2216_s26, %s2216_s26 }
 0x383   :  { %p2223_p13 = por %p2222_p12, %p2221_p11 }
 0x385   :  { %p2224_p0 = pnand %p2223_p13, %p2217_p10 }
 0x417   :  { %v1161_v35 = vpop.f32.mrb[14].mxu1 }
 0x418   :  { %1676 = vst [vmem:[#allocation7] sm:$0x1] %v1161_v35  ;;  %v1940_v36 = vpop.f32.mrb[15].mxu1 }
 0x41f   :  { %v1234_v37 = vpop.f32.mrb[16].mxu1 }
 0x420   :  { %1677 = vst [vmem:[#allocation7 + $0x1] sm:$0x1] %v1234_v37  ;;  %v1947_v49 = vpop.f32.mrb[17].mxu1 }
 0x427   :  { %v1307_v10 = vpop.f32.mrb[18].mxu0 }
 0x428   :  { %1678 = vst [vmem:[#allocation7 + $0x2] sm:$0x1] %v1307_v10  ;;  %v1954_v21 = vpop.f32.mrb[19].mxu0 }
 0x42f   :  { %v1380_v32 = vpop.f32.mrb[18].mxu1 }
 0x430   :  { %1679 = vst [vmem:[#allocation7 + $0x3] sm:$0x1] %v1380_v32  ;;  %v1961_v38 = vpop.f32.mrb[19].mxu1 }
 0x437   :  { %v1453_v39 = vpop.f32.mrb[20].mxu0 }
 0x438   :  { %1680 = vst [vmem:[#allocation7 + $0x4] sm:$0x1] %v1453_v39  ;;  %v1968_v40 = vpop.f32.mrb[21].mxu0 }
 0x43f   :  { %v1526_v27 = vpop.f32.mrb[20].mxu1 }
 0x440   :  { %1681 = vst [vmem:[#allocation7 + $0x5] sm:$0x1] %v1526_v27  ;;  %v1975_v41 = vpop.f32.mrb[21].mxu1 }
 0x443   :  { %v1672_v42 = vpop.f32.mrb[22].mxu1 }
 0x444   :  { %1683 = vst [vmem:[#allocation7 + $0x7] sm:$0x1] %v1672_v42  ;;  %v1989_v44 = vpop.f32.mrb[23].mxu1 }
 0x447   :  { %v1599_v45 = vpop.f32.mrb[22].mxu0 }
 0x448   :  { %1682 = vst [vmem:[#allocation7 + $0x6] sm:$0x1] %v1599_v45  ;;  %v1982_v43 = vpop.f32.mrb[23].mxu0 }
 0x449   :  { %2227 = shalt.err (!%p2224_p0)
}
 0x44a   :  { %s2228_s29 = scalar_lea.hbm %s2623_s5, 128 }
 0x44b   :  { %p2229_p1 = scmp.ne.s32.totalorder %s2623_s5, %s2228_s29  ;;  %p2232_p2 = scmp.lt.u32.totalorder %s2228_s29, %s2623_s5 }
 0x44d   :  { %p2234_p3 = pnand %p2232_p2, %p2229_p1 }
 0x44f   :  { %2237 = shalt.err (!%p2234_p3)
}
 0x450   :  { %1703 = dma.vmem_to_hbm [thread:$0]  %s1698_s25, 128, %s2623_s5, [#allocation4], %s2256_s22, %s2256_s22, %s2257_s0  }
 0x451   :  { %2242 = dma.done.wait [#allocation4], 128  }
 0x452   :  { %2243 = vsyncadd [#allocation4], 4294967168 }
 0x453   :  { %2244 = dma.done.wait [#allocation9], 128  }
 0x454   :  { %2245 = vsyncadd [#allocation9], 4294967168 }
 0x455   :  { %1722 = vsyncpa [#allocation3], 1 }
 0x456   :  { %1723 = vsyncpa [#allocation6], 1 }
 0x457   :  { %1724 = vsyncpa [#allocation4], 1 }
 0x458   :  { %1725 = vsyncpa [#allocation9], 1 }

</bundles_post_ra>
